<compile_context>
chip_gen: v7x
topology: tpu7x:2x2x1
jax: 0.10.0
libtpu: 0.0.40
codegen_flags: <defaults>
</compile_context>

<pallas_src>
import functools

import jax
import jax.numpy as jnp
import numpy as np
from jax.experimental import pallas as pl
from jax.experimental.pallas import tpu as pltpu


# ----------------------------- Pallas kernel --------------------------------
def vae_kernel(x_ref, eps_ref,
               w0_ref, b0_ref,
               wh_ref, bh_ref,
               wg0_ref, bg0_ref,
               wg1_ref, bg1_ref,
               recon_ref, heads_ref,
               *, L, latent):
    # ---- encode (bf16 operands, f32 accumulation) ----
    x = x_ref[...].astype(jnp.bfloat16)
    h = jnp.dot(x, w0_ref[...], preferred_element_type=jnp.float32) + b0_ref[...]
    h = jnp.maximum(h, 0.0)                                       # relu

    # fused mu / logvar head: one matmul -> [B, 2*latent] lane-dense slab
    heads = jnp.dot(h.astype(jnp.bfloat16), wh_ref[...],
                    preferred_element_type=jnp.float32) + bh_ref[...]
    heads_ref[...] = heads.astype(heads_ref.dtype)

    mu = heads[:, :latent]                                        # [B, latent]
    logvar = heads[:, latent:]                                    # [B, latent]

    # ---- reparameterize: all L samples folded into rows (L-major, matches eps layout) ----
    std = jnp.exp(0.5 * logvar)
    std_t = jnp.concatenate([std] * L, axis=0)                    # [L*B, latent]
    mu_t = jnp.concatenate([mu] * L, axis=0)                      # [L*B, latent]
    z = eps_ref[...] * std_t + mu_t                               # [L*B, latent], f32

    # ---- decode: one matmul per layer over all L*B rows ----
    hd = jnp.dot(z.astype(jnp.bfloat16), wg0_ref[...],
                 preferred_element_type=jnp.float32) + bg0_ref[...]
    hd = jnp.maximum(hd, 0.0)                                     # relu
    logits = jnp.dot(hd.astype(jnp.bfloat16), wg1_ref[...],
                     preferred_element_type=jnp.float32) + bg1_ref[...]
    recon_ref[...] = jax.nn.sigmoid(logits).astype(recon_ref.dtype)


# ----------------------------- wrapper ---------------------------------------
def vae_forward(x, eps, params):
    """x: [B, d] f32, eps: [L, B, latent] f32, params: dict of (in,out) weights + (1,out) biases."""
    B, d = x.shape
    L = eps.shape[0]
    latent = params["wmu"].shape[1]

    # Fuse the mu / sigma heads along the output (lane) dimension.
    wh = jnp.concatenate([params["wmu"], params["wsg"]], axis=1)      # [hid, 2*latent]
    bh = jnp.concatenate([params["bmu"], params["bsg"]], axis=1)      # [1,  2*latent]

    bf16 = lambda w: w.astype(jnp.bfloat16)
    args = (x,
            eps.reshape(L * B, latent),                               # fold L into rows (L-major)
            bf16(params["w0"]), params["b0"],
            bf16(wh), bh,
            bf16(params["wg0"]), params["bg0"],
            bf16(params["wg1"]), params["bg1"])

    vmem = pl.BlockSpec(memory_space=pltpu.MemorySpace.VMEM)
    # NOTE: for a large batch, tile B with a grid axis + BlockSpec index_maps and
    # dimension_semantics=("parallel",) to engage both TensorCores on v7x.
    recon2d, heads = pl.pallas_call(
        functools.partial(vae_kernel, L=L, latent=latent),
        out_shape=(jax.ShapeDtypeStruct((L * B, d), jnp.float32),     # lane-dense recon slab
                   jax.ShapeDtypeStruct((B, 2 * latent), jnp.float32)),  # fused mu|logvar slab
        in_specs=[vmem] * len(args),
        out_specs=(vmem, vmem),
    )(*args)

    recon = recon2d.reshape(L, B, d)
    mu = heads[:, :latent]
    logvar = heads[:, latent:]
    return recon, mu, logvar


# ----------------------------- reference (plain JAX, f32) --------------------
def vae_reference(x, eps, p):
    h = jnp.maximum(x @ p["w0"] + p["b0"], 0.0)
    mu = h @ p["wmu"] + p["bmu"]
    logvar = h @ p["wsg"] + p["bsg"]
    std = jnp.exp(0.5 * logvar)
    z = eps * std + mu                                    # [L, B, latent]
    hd = jnp.maximum(jnp.einsum("lbk,kn->lbn", z, p["wg0"]) + p["bg0"], 0.0)
    recon = jax.nn.sigmoid(jnp.einsum("lbk,kn->lbn", hd, p["wg1"]) + p["bg1"])
    return recon, mu, logvar


# ----------------------------- setup ------------------------------------------
def init_params(key, d, layer):
    """darray = [d] + layer; l = len(layer). Weights stored [in, out], biases [1, out]."""
    darray = [d] + list(layer)
    l = len(layer)
    ks = jax.random.split(key, 12)

    def lin(kw, kb, fin, fout):
        bound = 1.0 / np.sqrt(fin)
        w = jax.random.uniform(kw, (fin, fout), jnp.float32, -bound, bound)
        b = jax.random.uniform(kb, (1, fout), jnp.float32, -bound, bound)
        return w, b

    p = {}
    # encoder (l-1 == 1 hidden layer)
    p["w0"], p["b0"] = lin(ks[0], ks[1], darray[0], darray[1])
    p["wmu"], p["bmu"] = lin(ks[2], ks[3], darray[l - 1], darray[l])
    p["wsg"], p["bsg"] = lin(ks[4], ks[5], darray[l - 1], darray[l])
    # decoder (l == 2 layers)
    p["wg0"], p["bg0"] = lin(ks[6], ks[7], darray[l], darray[l - 1])
    p["wg1"], p["bg1"] = lin(ks[8], ks[9], darray[l - 1], darray[l - 2])
    return p


if __name__ == "__main__":
    d = 32
    layer = [24, 16]     # args.layer -> darray = [32, 24, 16], latent = 16
    L = 3                # args.L
    B = 8                # batch

    key = jax.random.PRNGKey(0)
    kx, keps, kp = jax.random.split(key, 3)

    x = jax.random.uniform(kx, (B, d), jnp.float32)                  # user-item interaction rows
    eps = jax.random.normal(keps, (L, B, layer[-1]), jnp.float32)    # stand-in for torch.randn
    params = init_params(kp, d, layer)

    recon, mu, logvar = vae_forward(x, eps, params)
    jax.block_until_ready((recon, mu, logvar))

    r_ref, mu_ref, lv_ref = vae_reference(x, eps, params)
    # bf16 matmul operands (f32 accumulation) -> loosened tolerance vs f32 reference.
    np.testing.assert_allclose(np.asarray(recon), np.asarray(r_ref), rtol=3e-2, atol=3e-2)
    np.testing.assert_allclose(np.asarray(mu), np.asarray(mu_ref), rtol=3e-2, atol=3e-2)
    np.testing.assert_allclose(np.asarray(logvar), np.asarray(lv_ref), rtol=3e-2, atol=3e-2)

    print("KERNEL_OK")
</pallas_src>

<mosaic_0001>
module attributes {stable_mosaic.version = 11 : i64} {
  func.func @vae_kernel(%arg0: memref<8x32xf32, #tpu.memory_space<vmem>>, %arg1: memref<24x16xf32, #tpu.memory_space<vmem>>, %arg2: memref<32x24xbf16, #tpu.memory_space<vmem>>, %arg3: memref<1x24xf32, #tpu.memory_space<vmem>>, %arg4: memref<24x32xbf16, #tpu.memory_space<vmem>>, %arg5: memref<1x32xf32, #tpu.memory_space<vmem>>, %arg6: memref<16x24xbf16, #tpu.memory_space<vmem>>, %arg7: memref<1x24xf32, #tpu.memory_space<vmem>>, %arg8: memref<24x32xbf16, #tpu.memory_space<vmem>>, %arg9: memref<1x32xf32, #tpu.memory_space<vmem>>, %arg10: memref<24x32xf32, #tpu.memory_space<vmem>>, %arg11: memref<8x32xf32, #tpu.memory_space<vmem>>) attributes {dimension_semantics = [], scalar_prefetch = 0 : i64, scratch_operands = 0 : i64, tpu.core_type = #tpu.core_type<tc>} {
    %c0 = arith.constant 0 : index
    %c0_0 = arith.constant 0 : index
    %0 = vector.load %arg0[%c0, %c0_0] : memref<8x32xf32, #tpu.memory_space<vmem>>, vector<8x32xf32>
    %1 = arith.truncf %0 : vector<8x32xf32> to vector<8x32xbf16>
    %c0_1 = arith.constant 0 : index
    %c0_2 = arith.constant 0 : index
    %2 = vector.load %arg2[%c0_1, %c0_2] : memref<32x24xbf16, #tpu.memory_space<vmem>>, vector<32x24xbf16>
    %cst = arith.constant dense<0.000000e+00> : vector<8x24xf32>
    %3 = tpu.matmul %1, %2, %cst {dimension_numbers = #tpu.dot_dimension_numbers<[1], [0], [0], [1], [0, 0, 1, 1], [], []>} : vector<8x32xbf16>, vector<32x24xbf16>, vector<8x24xf32> -> vector<8x24xf32>
    %c0_3 = arith.constant 0 : index
    %c0_4 = arith.constant 0 : index
    %4 = vector.load %arg3[%c0_3, %c0_4] : memref<1x24xf32, #tpu.memory_space<vmem>>, vector<1x24xf32>
    %5 = vector.broadcast %4 : vector<1x24xf32> to vector<8x24xf32>
    %6 = arith.addf %3, %5 : vector<8x24xf32>
    %cst_5 = arith.constant 0.000000e+00 : f32
    %7 = vector.broadcast %cst_5 : f32 to vector<8x24xf32>
    %8 = arith.maximumf %6, %7 : vector<8x24xf32>
    %9 = arith.truncf %8 : vector<8x24xf32> to vector<8x24xbf16>
    %c0_6 = arith.constant 0 : index
    %c0_7 = arith.constant 0 : index
    %10 = vector.load %arg4[%c0_6, %c0_7] : memref<24x32xbf16, #tpu.memory_space<vmem>>, vector<24x32xbf16>
    %cst_8 = arith.constant dense<0.000000e+00> : vector<8x32xf32>
    %11 = tpu.matmul %9, %10, %cst_8 {dimension_numbers = #tpu.dot_dimension_numbers<[1], [0], [0], [1], [0, 0, 1, 1], [], []>} : vector<8x24xbf16>, vector<24x32xbf16>, vector<8x32xf32> -> vector<8x32xf32>
    %c0_9 = arith.constant 0 : index
    %c0_10 = arith.constant 0 : index
    %12 = vector.load %arg5[%c0_9, %c0_10] : memref<1x32xf32, #tpu.memory_space<vmem>>, vector<1x32xf32>
    %13 = vector.broadcast %12 : vector<1x32xf32> to vector<8x32xf32>
    %14 = arith.addf %11, %13 : vector<8x32xf32>
    %c0_11 = arith.constant 0 : index
    %c0_12 = arith.constant 0 : index
    %15 = vector.load %arg11[%c0_11, %c0_12] : memref<8x32xf32, #tpu.memory_space<vmem>>, vector<8x32xf32>
    tpu.vector_store %arg11[%c0_11, %c0_12], %14 {strides = array<i32>} : memref<8x32xf32, #tpu.memory_space<vmem>>, vector<8x32xf32>,
    %16 = vector.extract_strided_slice %14 {offsets = [0, 0], sizes = [8, 16], strides = [1, 1]} : vector<8x32xf32> to vector<8x16xf32>
    %17 = vector.extract_strided_slice %14 {offsets = [0, 16], sizes = [8, 16], strides = [1, 1]} : vector<8x32xf32> to vector<8x16xf32>
    %cst_13 = arith.constant 5.000000e-01 : f32
    %18 = vector.broadcast %cst_13 : f32 to vector<8x16xf32>
    %19 = arith.mulf %18, %17 : vector<8x16xf32>
    %20 = math.exp %19 : vector<8x16xf32>
    %21 = tpu.concatenate %20, %20, %20 in 0 : vector<8x16xf32>, vector<8x16xf32>, vector<8x16xf32> -> vector<24x16xf32>
    %22 = tpu.concatenate %16, %16, %16 in 0 : vector<8x16xf32>, vector<8x16xf32>, vector<8x16xf32> -> vector<24x16xf32>
    %c0_14 = arith.constant 0 : index
    %c0_15 = arith.constant 0 : index
    %23 = vector.load %arg1[%c0_14, %c0_15] : memref<24x16xf32, #tpu.memory_space<vmem>>, vector<24x16xf32>
    %24 = arith.mulf %23, %21 : vector<24x16xf32>
    %25 = arith.addf %24, %22 : vector<24x16xf32>
    %26 = arith.truncf %25 : vector<24x16xf32> to vector<24x16xbf16>
    %c0_16 = arith.constant 0 : index
    %c0_17 = arith.constant 0 : index
    %27 = vector.load %arg6[%c0_16, %c0_17] : memref<16x24xbf16, #tpu.memory_space<vmem>>, vector<16x24xbf16>
    %cst_18 = arith.constant dense<0.000000e+00> : vector<24x24xf32>
    %28 = tpu.matmul %26, %27, %cst_18 {dimension_numbers = #tpu.dot_dimension_numbers<[1], [0], [0], [1], [0, 0, 1, 1], [], []>} : vector<24x16xbf16>, vector<16x24xbf16>, vector<24x24xf32> -> vector<24x24xf32>
    %c0_19 = arith.constant 0 : index
    %c0_20 = arith.constant 0 : index
    %29 = vector.load %arg7[%c0_19, %c0_20] : memref<1x24xf32, #tpu.memory_space<vmem>>, vector<1x24xf32>
    %30 = vector.broadcast %29 : vector<1x24xf32> to vector<24x24xf32>
    %31 = arith.addf %28, %30 : vector<24x24xf32>
    %cst_21 = arith.constant 0.000000e+00 : f32
    %32 = vector.broadcast %cst_21 : f32 to vector<24x24xf32>
    %33 = arith.maximumf %31, %32 : vector<24x24xf32>
    %34 = arith.truncf %33 : vector<24x24xf32> to vector<24x24xbf16>
    %c0_22 = arith.constant 0 : index
    %c0_23 = arith.constant 0 : index
    %35 = vector.load %arg8[%c0_22, %c0_23] : memref<24x32xbf16, #tpu.memory_space<vmem>>, vector<24x32xbf16>
    %cst_24 = arith.constant dense<0.000000e+00> : vector<24x32xf32>
    %36 = tpu.matmul %34, %35, %cst_24 {dimension_numbers = #tpu.dot_dimension_numbers<[1], [0], [0], [1], [0, 0, 1, 1], [], []>} : vector<24x24xbf16>, vector<24x32xbf16>, vector<24x32xf32> -> vector<24x32xf32>
    %c0_25 = arith.constant 0 : index
    %c0_26 = arith.constant 0 : index
    %37 = vector.load %arg9[%c0_25, %c0_26] : memref<1x32xf32, #tpu.memory_space<vmem>>, vector<1x32xf32>
    %38 = vector.broadcast %37 : vector<1x32xf32> to vector<24x32xf32>
    %39 = arith.addf %36, %38 : vector<24x32xf32>
    %40 = arith.negf %39 : vector<24x32xf32>
    %41 = math.exp %40 : vector<24x32xf32>
    %cst_27 = arith.constant 1.000000e+00 : f32
    %42 = vector.broadcast %cst_27 : f32 to vector<24x32xf32>
    %43 = arith.addf %42, %41 : vector<24x32xf32>
    %44 = arith.divf %42, %43 : vector<24x32xf32>
    %c0_28 = arith.constant 0 : index
    %c0_29 = arith.constant 0 : index
    %45 = vector.load %arg10[%c0_28, %c0_29] : memref<24x32xf32, #tpu.memory_space<vmem>>, vector<24x32xf32>
    tpu.vector_store %arg10[%c0_28, %c0_29], %44 {strides = array<i32>} : memref<24x32xf32, #tpu.memory_space<vmem>>, vector<24x32xf32>,
    return
  }
}

</mosaic_0001>

<bundles_post_ra>
// kernel: tpu_custom_call.1
= control target key start
LH: loop header
LB: loop body
LE: loop exit
PB: predicated region body
PF: predicated region fallthrough
CT: control target
= control target key end

     0   :  { %17 = vsyncpa [#allocation3], 0  ;;  %v539_v1 = vmov 0.0   ;;  %vm540_vm0 = vmmov 0   ;;  %s686_s0 = inlined_call_operand.vmem [shape: f32[8,32], index: 0, kind: input, shape index: {}]   ;;  %s687_s1 = inlined_call_operand.vmem [shape: f32[24,16], index: 1, kind: input, shape index: {}]   ;;  %s688_s2 = inlined_call_operand.vmem [shape: bf16[32,24], index: 2, kind: input, shape index: {}]   ;;  %s689_s3 = inlined_call_operand.vmem [shape: f32[1,24], index: 3, kind: input, shape index: {}]   ;;  %s690_s4 = inlined_call_operand.vmem [shape: bf16[24,32], index: 4, kind: input, shape index: {}]   ;;  %s691_s5 = inlined_call_operand.vmem [shape: f32[1,32], index: 5, kind: input, shape index: {}]   ;;  %s692_s6 = inlined_call_operand.vmem [shape: bf16[16,24], index: 6, kind: input, shape index: {}]   ;;  %s693_s7 = inlined_call_operand.vmem [shape: f32[1,24], index: 7, kind: input, shape index: {}]   ;;  %s694_s8 = inlined_call_operand.vmem [shape: bf16[24,32], index: 8, kind: input, shape index: {}]   ;;  %s695_s9 = inlined_call_operand.vmem [shape: f32[1,32], index: 9, kind: input, shape index: {}]   ;;  %s696_s10 = inlined_call_operand.hbm [shape: f32[24,32], index: 10, kind: output, shape index: {0}]   ;;  %s697_s11 = inlined_call_operand.hbm [shape: f32[8,32], index: 11, kind: output, shape index: {1}]  }
   0x1   :  { %v470_v0 = vld [vmem:[%s688_s2] sm:$0xff]   ;;  %432 = vmatprep.subr.bf16.mxu0 %v539_v1  ;;  %440 = vmatprep.subr.bf16.mxu1 %v539_v1  ;;  %v471_v2 = vld [vmem:[%s688_s2 + $0x8] sm:$0xff]  }
   0x2   :  { %433 = vmatpush3.bf16.msra.mxu0 %v470_v0  ;;  %436 = vmatprep.mubr.msk.bf16.mxu0 %vm540_vm0, %v539_v1  ;;  %v40_v3 = vld [vmem:[%s686_s0] sm:$0xff] }
   0x3   :  { %434 = vmatprep.subr.bf16.mxu0 %v539_v1  ;;  %444 = vmatprep.mubr.msk.bf16.mxu1 %vm540_vm0, %v539_v1  ;;  %v41_v4 = vpack.c.bf16 %v40_v3, %v40_v3 }
   0x4   :  { %18 = vsyncpa [#allocation5], 0  ;;  %vm65_vm1 = vcmask 261120   ;;  %v472_v5 = vld [vmem:[%s690_s4] sm:$0xff]   ;;  %v473_v6 = vld [vmem:[%s690_s4 + $0x8] ss:$0 sps:$4 sm:$0xff]  }
   0x5   :  { %441 = vmatpush3.bf16.msra.mxu1 %v472_v5  ;;  %vm134_vm2 = vcmask 1043456   ;;  %v399_v8 = vld [vmem:[%s689_s3] ss:$0 sm:$0xff]  ;;  %vm130_vm3 = vcmask 195584   ;;  %s541_s3 = smov 112   ;;  %v183_v27 = vld [vmem:[%s687_s1 + $0x8] sm:$0xff] }
   0x6   :  { %435 = vmatpush3.bf16.msra.mxu0 %v471_v2  ;;  %442 = vmatprep.subr.bf16.mxu1 %v539_v1  ;;  %v136_v7 = vsel %vm134_vm2, %v473_v6, 0  ;;  %v474_v16 = vld [vmem:[%s692_s6] sm:$0xff]   ;;  %v184_v28 = vld [vmem:[%s687_s1 + $0x10] sm:$0xff]  ;;  %vm212_vm4 = vcmask 130048   ;;  %v476_v39 = vld [vmem:[%s694_s8 + $0x8] ss:$0 sps:$4 sm:$0xff]  }
   0x7   :  { %448 = vmatprep.subr.bf16.mxu0 %v474_v16  ;;  %v403_v17 = vld [vmem:[%s691_s5] ss:$0 sm:$0xff]  ;;  %v298_v40 = vsel %vm134_vm2, %v476_v39, 0 }
   0x8   :  { %v182_v26 = vld [vmem:[%s687_s1] sm:$0xff] }
   0x9   :  { %437 = vmatmul.mubr.msk.bf16.vlgmr.msra.gmra.mrb[0].mxu0 %vm65_vm1, %v41_v4  ;;  %443 = vmatpush3.bf16.msra.mxu1 %v136_v7  ;;  %v475_v38 = vld [vmem:[%s694_s8] sm:$0xff]   ;;  %s542_s8 = smov [#allocation4]  }
   0xa   :  { %449 = vmatpush3.bf16.msra.mxu0 %v474_v16  ;;  %454 = vmatprep.subr.bf16.mxu1 %v475_v38  ;;  %v407_v41 = vld [vmem:[%s693_s7] ss:$0 sm:$0xff]  ;;  %s387_s20 = sshll.u32 %s542_s8, 4  ;;  %s388_s20 = int_to_ptr.vmem [resolvable:$true] %s387_s20 }
   0xb   :  { %s491_s7 = scalar_lea.vmem %s388_s20, 128  ;;  %p496_p1 = scmp.lt.s32.totalorder %s388_s20, %s388_s20 }
   0xc   :  { %p492_p0 = scmp.ne.s32.totalorder %s388_s20, %s491_s7  ;;  %p497_p2 = scmp.lt.s32.totalorder %s491_s7, %s491_s7 }
   0xe   :  { %p498_p3 = por %p497_p2, %p496_p1 }
  0x10   :  { %p499_p4 = pnand %p498_p3, %p492_p0 }
  0xdc   :  { %v103_v9 = vpop.f32.mrb[0].mxu0 }
  0xdd   :  { %v104_v10 = vadd.f32 %v399_v8, %v103_v9  ;;  %v438_v11 = vpop.f32.mrb[1].mxu0 }
  0xde   :  { %v106_v12 = vpop.f32.mrb[2].mxu0 }
  0xdf   :  { %v109_v13 = vmax.f32 %v104_v10, 0.0  ;;  %v439_v14 = vpop.f32.mrb[3].mxu0 }
  0xe1   :  { %v110_v15 = vpack.c.bf16 %v109_v13, %v109_v13 }
  0xe3   :  { %445 = vmatmul.mubr.msk.bf16.vlgmr.msra.gmra.mrb[0].mxu1 %vm130_vm3, %v110_v15 }
  0xe4   :  { %455 = vmatpush3.bf16.msra.mxu1 %v475_v38 }
  0xe5   :  { %462 = vmatprep.subr.msk.bf16.mxu1 %vm134_vm2, %v476_v39 }
  0xe8   :  { %457 = vmatpush3.bf16.msra.mxu1 %v298_v40 }
 0x1b6   :  { %v172_v18 = vpop.f32.mrb[0].mxu1 }
 0x1b7   :  { %v173_v19 = vadd.f32 %v403_v17, %v172_v18  ;;  %v446_v20 = vpop.f32.mrb[1].mxu1 }
 0x1b8   :  { %v175_v21 = vpop.f32.mrb[2].mxu1 }
 0x1b9   :  { %178 = vst.msk [vmem:[#allocation4] sm:$0xff] %vm65_vm1, %v173_v19  ;;  %v447_v22 = vpop.f32.mrb[3].mxu1  ;;  %v179_v23 = vmul.f32 0.5, %v173_v19 }
 0x1bb   :  { %v180_v24 = vmul.f32 1.442695, %v179_v23 }
 0x1bd   :  { %477 = vpow2.f32 %v180_v24 }
 0x1c7   :  { %v478_v25 = vpop.eup %477 }
 0x1c8   :  { %186 = vrot.lane.b32.xlu0 %v478_v25, %s541_s3 }
 0x23a   :  { %v187_v29 = vpop.permute.xlu0 %186 }
 0x23b   :  { %v189_v30 = vmul.f32 %v187_v29, %v182_v26  ;;  %v190_v31 = vmul.f32 %v187_v29, %v183_v27  ;;  %v191_v32 = vmul.f32 %v187_v29, %v184_v28 }
 0x23d   :  { %v192_v33 = vadd.f32 %v189_v30, %v173_v19  ;;  %v193_v34 = vadd.f32 %v190_v31, %v173_v19  ;;  %v194_v35 = vadd.f32 %v191_v32, %v173_v19 }
 0x23f   :  { %v195_v36 = vpack.c.bf16 %v193_v34, %v192_v33  ;;  %v196_v37 = vpack.c.bf16 %v194_v35, %v194_v35 }
 0x241   :  { %450 = vmatprep.mubr.msk.bf16.mxu0 %vm212_vm4, %v195_v36 }
 0x242   :  { %451 = vmatmul.mubr.msk.bf16.vlgmr.msra.gmra.mrb[4].mxu0 %vm212_vm4, %v196_v37 }
 0x315   :  { %v452_v42 = vpop.f32.mrb[4].mxu0 }
 0x316   :  { %v262_v43 = vadd.f32 %v452_v42, %v407_v41  ;;  %v253_v44 = vpop.f32.mrb[5].mxu0 }
 0x317   :  { %v254_v45 = vadd.f32 %v407_v41, %v253_v44  ;;  %v453_v46 = vpop.f32.mrb[6].mxu0 }
 0x318   :  { %v256_v47 = vpop.f32.mrb[7].mxu0  ;;  %v269_v49 = vmax.f32 %v262_v43, 0.0 }
 0x319   :  { %v257_v48 = vadd.f32 %v407_v41, %v256_v47  ;;  %v267_v50 = vmax.f32 %v254_v45, 0.0 }
 0x31a   :  { %v271_v53 = vpack.c.bf16 %v269_v49, %v269_v49 }
 0x31b   :  { %v268_v51 = vmax.f32 %v257_v48, 0.0 }
 0x31d   :  { %v270_v52 = vpack.c.bf16 %v268_v51, %v267_v50 }
 0x31f   :  { %458 = vmatprep.mubr.msk.bf16.mxu1 %vm130_vm3, %v270_v52 }
 0x320   :  { %459 = vmatmul.mubr.msk.bf16.vlgmr.msra.gmra.mrb[4].mxu1 %vm130_vm3, %v271_v53 }
 0x321   :  { %502 = shalt.err (!%p499_p4)
}
 0x322   :  { %s503_s23 = scalar_lea.hbm %s697_s11, 128 }
 0x323   :  { %p504_p5 = scmp.ne.s32.totalorder %s697_s11, %s503_s23  ;;  %p507_p6 = scmp.lt.u32.totalorder %s503_s23, %s697_s11 }
 0x325   :  { %p509_p7 = pnand %p507_p6, %p504_p5 }
 0x327   :  { %512 = shalt.err (!%p509_p7)
}
 0x328   :  { %390 = dma.vmem_to_hbm [thread:$0]  %s388_s20, 128, %s697_s11, [#allocation5]   ;;  %v411_v54 = vld [vmem:[%s695_s9] ss:$0 sm:$0xff] }
 0x329   :  { %s543_s9 = smov [#allocation2]  }
 0x32a   :  { %s374_s11 = sshll.u32 %s543_s9, 4  ;;  %s375_s11 = int_to_ptr.vmem [resolvable:$true] %s374_s11 }
 0x32b   :  { %s513_s29 = scalar_lea.vmem %s375_s11, 384  ;;  %p518_p9 = scmp.lt.s32.totalorder %s375_s11, %s375_s11 }
 0x32c   :  { %p514_p8 = scmp.ne.s32.totalorder %s375_s11, %s513_s29  ;;  %p519_p10 = scmp.lt.s32.totalorder %s513_s29, %s513_s29 }
 0x32e   :  { %p520_p11 = por %p519_p10, %p518_p9 }
 0x330   :  { %p521_p12 = pnand %p520_p11, %p514_p8 }
 0x3f3   :  { %v460_v55 = vpop.f32.mrb[4].mxu1 }
 0x3f4   :  { %v343_v56 = vadd.f32 %v460_v55, %v411_v54  ;;  %v334_v57 = vpop.f32.mrb[5].mxu1 }
 0x3f5   :  { %v335_v58 = vadd.f32 %v411_v54, %v334_v57  ;;  %v461_v59 = vpop.f32.mrb[6].mxu1 }
 0x3f6   :  { %v418_v60 = vmul.f32 -1.442695, %v343_v56  ;;  %v337_v61 = vpop.f32.mrb[7].mxu1 }
 0x3f7   :  { %v416_v62 = vmul.f32 -1.442695, %v335_v58  ;;  %v338_v63 = vadd.f32 %v411_v54, %v337_v61 }
 0x3f8   :  { %479 = vpow2.f32 %v418_v60 }
 0x3f9   :  { %481 = vpow2.f32 %v416_v62  ;;  %v417_v0 = vmul.f32 -1.442695, %v338_v63 }
 0x3fb   :  { %483 = vpow2.f32 %v417_v0 }
 0x402   :  { %v480_v1 = vpop.eup %479 }
 0x403   :  { %v482_v2 = vpop.eup %481  ;;  %v359_v3 = vadd.f32 1.0, %v480_v1 }
 0x404   :  { %v357_v4 = vadd.f32 1.0, %v482_v2 }
 0x405   :  { %v484_v5 = vpop.eup %483  ;;  %485 = vrcp.f32 %v359_v3 }
 0x406   :  { %487 = vrcp.f32 %v357_v4  ;;  %v358_v6 = vadd.f32 1.0, %v484_v5 }
 0x408   :  { %489 = vrcp.f32 %v358_v6 }
 0x40f   :  { %v486_v7 = vpop.eup %485 }
 0x410   :  { %v488_v8 = vpop.eup %487  ;;  %368 = vst.msk [vmem:[#allocation2 + $0x10] sm:$0xff] %vm65_vm1, %v486_v7 }
 0x411   :  { %366 = vst.msk [vmem:[#allocation2] sm:$0xff] %vm65_vm1, %v488_v8 }
 0x412   :  { %v490_v9 = vpop.eup %489 }
 0x413   :  { %367 = vst.msk [vmem:[#allocation2 + $0x8] sm:$0xff] %vm65_vm1, %v490_v9 }
 0x414   :  { %524 = shalt.err (!%p521_p12)
}
 0x415   :  { %s525_s30 = scalar_lea.hbm %s696_s10, 384 }
 0x416   :  { %p526_p13 = scmp.ne.s32.totalorder %s696_s10, %s525_s30  ;;  %p529_p0 = scmp.lt.u32.totalorder %s525_s30, %s696_s10 }
 0x418   :  { %p531_p1 = pnand %p529_p0, %p526_p13 }
 0x41a   :  { %534 = shalt.err (!%p531_p1)
}
 0x41b   :  { %s544_s15 = smov 128   ;;  %s545_s16 = smov 8  }
 0x41c   :  { %380 = dma.vmem_to_hbm [thread:$0]  %s375_s11, 384, %s696_s10, [#allocation3], %s544_s15, %s544_s15, %s545_s16  }
 0x41d   :  { %535 = dma.done.wait [#allocation3], 384  }
 0x41e   :  { %536 = vsyncadd [#allocation3], 4294966912 }
 0x41f   :  { %537 = dma.done.wait [#allocation5], 128  }
 0x420   :  { %538 = vsyncadd [#allocation5], 4294967168 }
 0x421   :  { %397 = vsyncpa [#allocation3], 1 }
 0x422   :  { %398 = vsyncpa [#allocation5], 1 }

</bundles_post_ra>
